<compile_context>
chip_gen: v5e
topology: v5e:2x2
jax: 0.10.0
libtpu: 0.0.40
codegen_flags: <defaults>
</compile_context>

<pallas_src>
import jax
import jax.numpy as jnp
from jax.experimental import pallas as pl
from jax.experimental.pallas import tpu as pltpu

LANE = 128      # vreg lane width (same on v5e/v6e/v7x)
SUBLANE = 8     # f32 sublane count per vreg


def _round_up(x, m):
    return ((x + m - 1) // m) * m


def identity_kernel(x_ref, o_ref):
    # Pure streaming copy of one (TM, 128) lane-dense tile.
    o_ref[...] = x_ref[...]


def pallas_identity(x, *, tile_rows=512):
    """Identity forward: returns x, streamed through a tiled Pallas copy kernel.

    The array is viewed as a (rows, 128) lane-dense 2-D slab (padded only if the
    element count is not a multiple of 128*8), tiled over rows, and copied
    tile-by-tile with BlockSpec auto-pipelining.
    """
    if x.size == 0:
        return x

    orig_shape = x.shape
    flat = x.reshape(-1)
    n = flat.shape[0]

    rows = pl.cdiv(n, LANE)
    # Row-tile: multiple of 8 sublanes. 512 x 128 x 4 B = 256 KiB per buffer;
    # with double-buffered in+out that is ~1 MiB — far under the scoped-VMEM
    # default on every generation (16 MiB v5e, 32 MiB v6e/v7x) and trivially
    # within v7x's 64 MiB physical VMEM.
    tm = _round_up(min(tile_rows, _round_up(rows, SUBLANE)), SUBLANE)
    rows_padded = _round_up(rows, tm)
    n_padded = rows_padded * LANE

    if n_padded != n:
        flat = jnp.pad(flat, (0, n_padded - n))
    x2d = flat.reshape(rows_padded, LANE)

    grid = (rows_padded // tm,)
    bytes_accessed = 2 * n_padded * x2d.dtype.itemsize  # read + write

    # TODO(synk): with buffer donation at the call site, input_output_aliases
    # could make this a true zero-copy identity; kept as an explicit copy so the
    # kernel is self-contained and donation-agnostic.
    out2d = pl.pallas_call(
        identity_kernel,
        out_shape=jax.ShapeDtypeStruct((rows_padded, LANE), x2d.dtype),
        grid=grid,
        in_specs=[pl.BlockSpec((tm, LANE), lambda i: (i, 0))],
        out_specs=pl.BlockSpec((tm, LANE), lambda i: (i, 0)),
        compiler_params=pltpu.CompilerParams(
            dimension_semantics=("parallel",),   # v7x: shard grid across 2 TCs
            vmem_limit_bytes=64 * 1024 * 1024,
        ),
        cost_estimate=pl.CostEstimate(
            flops=0, transcendentals=0, bytes_accessed=bytes_accessed),
    )(x2d)

    return out2d.reshape(-1)[:n].reshape(orig_shape)


if __name__ == "__main__":
    key = jax.random.PRNGKey(0)
    # Small 4-D input consistent with how Identity is used inside Inception ops.
    x = jax.random.normal(key, (2, 4, 16, 16), dtype=jnp.float32)

    identity_fn = jax.jit(pallas_identity)
    out = identity_fn(x)
    out = jax.block_until_ready(out)

    assert out.shape == x.shape and out.dtype == x.dtype
    assert jnp.array_equal(out, x), "identity kernel mismatch"
    print("KERNEL_OK")
</pallas_src>

<mosaic_0001>
module attributes {stable_mosaic.version = 11 : i64} {
  func.func @identity_kernel(%arg0: i32, %arg1: memref<16x128xf32, #tpu.memory_space<vmem>>, %arg2: memref<16x128xf32, #tpu.memory_space<vmem>>) attributes {dimension_semantics = [#tpu.dimension_semantics<parallel>], iteration_bounds = array<i64: 1>, scalar_prefetch = 0 : i64, scratch_operands = 0 : i64, tpu.core_type = #tpu.core_type<tc>, window_params = [{transform_indices = @transform_0, window_bounds = array<i64: 16, 128>}, {transform_indices = @transform_1, window_bounds = array<i64: 16, 128>}]} {
    %c0 = arith.constant 0 : index
    %c0_0 = arith.constant 0 : index
    %0 = vector.load %arg1[%c0, %c0_0] : memref<16x128xf32, #tpu.memory_space<vmem>>, vector<16x128xf32>
    %c0_1 = arith.constant 0 : index
    %c0_2 = arith.constant 0 : index
    %1 = vector.load %arg2[%c0_1, %c0_2] : memref<16x128xf32, #tpu.memory_space<vmem>>, vector<16x128xf32>
    tpu.vector_store %arg2[%c0_1, %c0_2], %0 {strides = array<i32>} : memref<16x128xf32, #tpu.memory_space<vmem>>, vector<16x128xf32>,
    return
  }
  func.func @transform_0(%arg0: i32) -> (i32, i32) {
    %c0_i32 = arith.constant 0 : i32
    %c0_i32_0 = arith.constant 0 : i32
    return %arg0, %c0_i32 : i32, i32
  }
  func.func @transform_1(%arg0: i32) -> (i32, i32) {
    %c0_i32 = arith.constant 0 : i32
    %c0_i32_0 = arith.constant 0 : i32
    return %arg0, %c0_i32 : i32, i32
  }
}

</mosaic_0001>

<bundles_post_ra>
// kernel: pallas_identity.1
= control target key start
LH: loop header
LB: loop body
LE: loop exit
PB: predicated region body
PF: predicated region fallthrough
CT: control target
= control target key end

     0   :  { %s38_s0 = inlined_call_operand.vmem [shape: f32[16,128], index: 0, kind: input, shape index: {}]   ;;  %s39_s1 = inlined_call_operand.vmem [shape: f32[16,128], index: 1, kind: output, shape index: {}]  }
   0x1   :  { %v8_v0 = vld [vmem:[%s38_s0] sm:$0xff]  ;;  %v9_v1 = vld [vmem:[%s38_s0 + $0x8] sm:$0xff] }
   0x2   :  { %10 = vst [vmem:[%s39_s1] sm:$0xff] %v8_v0 }
   0x3   :  { %11 = vst [vmem:[%s39_s1 + $0x8] sm:$0xff] %v9_v1 }

</bundles_post_ra>
